<compile_context>
chip_gen: v5e
topology: v5e:2x2
jax: 0.10.0
libtpu: 0.0.40
codegen_flags: <defaults>
</compile_context>

<pallas_src>
import functools

import jax
import jax.numpy as jnp
from jax.experimental import pallas as pl
from jax.experimental.pallas import tpu as pltpu


_LANE = 128
_SUBLANE = 8


def _round_up(x, m):
    return (x + m - 1) // m * m


def _vmem_capacity_bytes():
    try:
        return int(pltpu.get_tpu_info().vmem_capacity_bytes)
    except Exception:
        return 128 * 1024 * 1024  # v5e/v6e default assumption


def _loss_kernel(label_ref, odr_ref, zsr_ref, aux_ref, out_ref, *, sigma, total_rows):
    lbl = label_ref[...]                                   # (tB, 1) int32
    odr = odr_ref[...].astype(jnp.float32)                 # (tB, C)
    zsr = zsr_ref[...].astype(jnp.float32)
    aux = aux_ref[...].astype(jnp.float32)
    tB, C = odr.shape

    # Row validity from grid position: the last block may extend past B; those
    # rows contain unspecified data and are masked out of every reduction.
    row = jax.lax.broadcasted_iota(jnp.int32, (tB, 1), 0)
    valid = (pl.program_id(0) * tB + row) < total_rows     # (tB, 1) bool

    col = jax.lax.broadcasted_iota(jnp.int32, (tB, C), 1)
    mask = col == lbl                                      # boolean one-hot

    # --- ODR loss: one exp pass, non-label sum computed directly -------------
    m = jnp.max(odr, axis=1, keepdims=True)                          # (tB, 1)
    tgt = jnp.sum(jnp.where(mask, odr, 0.0), axis=1, keepdims=True)  # odr[i, label]
    s_nl = jnp.sum(jnp.where(mask, 0.0, jnp.exp(odr - m)),
                   axis=1, keepdims=True)                            # sum over j!=label
    e_tgt = jnp.exp(tgt - m)                                         # exp at label col
    lse = m + jnp.log(s_nl + e_tgt)

    # y = softmax(odr)[i, label[i]]  (forward value; PyTorch detaches it)
    y = jnp.exp(tgt - lse)
    mw = jnp.exp(-((y - 1.0) ** 2) / sigma)

    # Modified logits differ from odr only in the label column.
    tgt_mod = tgt * (1.0 - mw)
    m2 = jnp.maximum(m, tgt_mod)
    sum_mod = s_nl * jnp.exp(m - m2) + jnp.exp(tgt_mod - m2)         # strictly > 0
    lse_mod = m2 + jnp.log(sum_mod)
    t_odr = lse_mod - tgt_mod                                        # per-row CE term

    # --- ZSL loss -------------------------------------------------------------
    zsr_tgt = jnp.sum(jnp.where(mask, zsr, 0.0), axis=1, keepdims=True)
    t_zsr = 1.0 - zsr_tgt

    # --- AUX cross-entropy ----------------------------------------------------
    m_a = jnp.max(aux, axis=1, keepdims=True)
    lse_a = m_a + jnp.log(jnp.sum(jnp.exp(aux - m_a), axis=1, keepdims=True))
    tgt_a = jnp.sum(jnp.where(mask, aux, 0.0), axis=1, keepdims=True)
    t_aux = lse_a - tgt_a

    # Per-block partial sums (where() so garbage/NaN in invalid rows can't leak).
    s_odr = jnp.sum(jnp.where(valid, t_odr, 0.0), axis=0, keepdims=True)   # (1,1)
    s_zsr = jnp.sum(jnp.where(valid, t_zsr, 0.0), axis=0, keepdims=True)
    s_aux = jnp.sum(jnp.where(valid, t_aux, 0.0), axis=0, keepdims=True)

    # Lane-dense (8,128) output tile: sublane 0/1/2 = odr/zsr/aux partial sums.
    sub = jax.lax.broadcasted_iota(jnp.int32, (_SUBLANE, _LANE), 0)
    tile = (jnp.where(sub == 0, s_odr, 0.0)
            + jnp.where(sub == 1, s_zsr, 0.0)
            + jnp.where(sub == 2, s_aux, 0.0))
    out_ref[0] = tile


def seen_dvbe_loss(label, odr_logit, zsr_logit, zsr_logit_aux, sigma, block_b=None):
    """Forward pass of the seenDvbe `Loss` module.

    Returns (total_loss, L_odr, L_zsr, L_aux), matching the PyTorch module.
    """
    B, C = odr_logit.shape
    itemsize = jnp.dtype(odr_logit.dtype).itemsize

    # ---- Generation-aware VMEM budget -> batch tile size ---------------------
    vmem_cap = _vmem_capacity_bytes()
    if vmem_cap <= 96 * 1024 * 1024:          # v7x: 64 MiB per-TC VMEM
        scoped_limit = 40 * 1024 * 1024
        budget = 20 * 1024 * 1024
    else:                                      # v5e / v6e: 128 MiB
        scoped_limit = 48 * 1024 * 1024
        budget = 32 * 1024 * 1024

    C_vmem = _round_up(C, _LANE)               # lane footprint of one logit row in VMEM
    # 3 logit streams x 2 pipeline buffers + ~5 tile-sized f32 kernel temporaries
    # + double-buffered (tile_b,1) i32 labels (lane-padded to 128 in VMEM).
    bytes_per_row = 3 * 2 * C_vmem * itemsize + 5 * C_vmem * 4 + 2 * _LANE * 4
    tile_b = (budget // bytes_per_row) // _SUBLANE * _SUBLANE
    tile_b = max(_SUBLANE, min(tile_b, _round_up(B, _SUBLANE)))
    if block_b is not None:
        tile_b = max(_SUBLANE, min(tile_b, _round_up(block_b, _SUBLANE)))
    num_blocks = pl.cdiv(B, tile_b)

    # Keep >=2 blocks so both v7x TensorCores get work under "parallel" grid.
    if num_blocks == 1 and B > _SUBLANE:
        tile_b = max(_SUBLANE, _round_up(pl.cdiv(B, 2), _SUBLANE))
        num_blocks = pl.cdiv(B, tile_b)

    lbl2d = label.astype(jnp.int32).reshape(B, 1)

    kernel = functools.partial(_loss_kernel, sigma=float(sigma), total_rows=B)

    logit_spec = pl.BlockSpec((tile_b, C), lambda i: (i, 0))
    grid_spec = pltpu.PrefetchScalarGridSpec(
        num_scalar_prefetch=0,
        grid=(num_blocks,),
        in_specs=[
            pl.BlockSpec((tile_b, 1), lambda i: (i, 0)),   # labels
            logit_spec, logit_spec, logit_spec,            # odr / zsr / aux logits
        ],
        out_specs=pl.BlockSpec((1, _SUBLANE, _LANE), lambda i: (i, 0, 0)),
    )

    cost = pl.CostEstimate(
        flops=12 * B * C,
        transcendentals=2 * B * C + 8 * B,
        bytes_accessed=3 * B * C * itemsize + B * 4
        + num_blocks * _SUBLANE * _LANE * 4,
    )

    partials = pl.pallas_call(
        kernel,
        out_shape=jax.ShapeDtypeStruct((num_blocks, _SUBLANE, _LANE), jnp.float32),
        grid_spec=grid_spec,
        compiler_params=pltpu.CompilerParams(
            dimension_semantics=("parallel",),
            vmem_limit_bytes=scoped_limit,
        ),
        cost_estimate=cost,
    )(lbl2d, odr_logit, zsr_logit, zsr_logit_aux)

    sums = jnp.sum(partials[:, :, 0], axis=0)     # sublanes 0..2 hold the partial sums
    inv_b = 1.0 / B
    L_odr = sums[0] * inv_b
    L_zsr = sums[1] * inv_b
    L_aux = sums[2] * inv_b
    total = L_odr + L_zsr + L_aux
    # TODO(synk): backward (custom VJP) not implemented; PyTorch detaches `prob`
    # so only the gradient path differs, not this forward value.
    return total, L_odr, L_zsr, L_aux


def _reference(label, odr_logit, zsr_logit, zsr_logit_aux, sigma):
    """Pure-JAX reference mirroring the PyTorch forward, for a sanity check."""
    B = label.shape[0]
    idx = jnp.arange(B)
    prob = jax.nn.softmax(odr_logit, axis=1)
    y = prob[idx, label]
    mw = jnp.exp(-((y - 1.0) ** 2) / sigma)
    one_hot = jax.nn.one_hot(label, odr_logit.shape[1], dtype=odr_logit.dtype)
    odr_mod = odr_logit * (1.0 - one_hot * mw[:, None])

    def ce(logits):
        lse = jax.nn.logsumexp(logits, axis=1)
        return jnp.mean(lse - logits[idx, label])

    L_odr = ce(odr_mod)
    L_zsr = jnp.mean(1.0 - zsr_logit[idx, label])
    L_aux = ce(zsr_logit_aux)
    return L_odr + L_zsr + L_aux, L_odr, L_zsr, L_aux


if __name__ == "__main__":
    sigma = 0.5
    base_key = jax.random.PRNGKey(0)

    def run_case(B, C, block_b=None, dtype=jnp.float32, atol=1e-5, rtol=1e-5):
        k1, k2, k3, k4 = jax.random.split(jax.random.fold_in(base_key, B * 1000 + C), 4)
        label = jax.random.randint(k1, (B,), 0, C, dtype=jnp.int32)
        odr = jax.random.normal(k2, (B, C), dtype=jnp.float32).astype(dtype)
        zsr = jax.random.normal(k3, (B, C), dtype=jnp.float32).astype(dtype)
        aux = jax.random.normal(k4, (B, C), dtype=jnp.float32).astype(dtype)

        got = seen_dvbe_loss(label, odr, zsr, aux, sigma, block_b=block_b)
        jax.block_until_ready(got)
        # Reference computes in f32 on the (possibly bf16-rounded) values.
        ref = _reference(label, odr.astype(jnp.float32), zsr.astype(jnp.float32),
                         aux.astype(jnp.float32), sigma)
        for g, r in zip(got, ref):
            assert jnp.allclose(g, r, atol=atol, rtol=rtol), (B, C, dtype, g, r)

    run_case(8, 32)                            # single block, ragged class axis
    run_case(13, 50)                           # ragged batch (masked tail rows) + ragged C
    run_case(24, 160, block_b=8)               # multi-block grid ("parallel" batch axis)
    run_case(16, 96, dtype=jnp.bfloat16,       # bf16 logits, f32 accumulation in-kernel
             atol=1e-4, rtol=1e-4)

    print("KERNEL_OK")
</pallas_src>

<mosaic_0001>
module attributes {stable_mosaic.version = 11 : i64} {
  func.func @_loss_kernel(%arg0: i32, %arg1: memref<8x1xi32, #tpu.memory_space<vmem>>, %arg2: memref<8x32xf32, #tpu.memory_space<vmem>>, %arg3: memref<8x32xf32, #tpu.memory_space<vmem>>, %arg4: memref<8x32xf32, #tpu.memory_space<vmem>>, %arg5: memref<1x8x128xf32, #tpu.memory_space<vmem>>) attributes {dimension_semantics = [#tpu.dimension_semantics<parallel>], iteration_bounds = array<i64: 1>, scalar_prefetch = 0 : i64, scratch_operands = 0 : i64, tpu.core_type = #tpu.core_type<tc>, window_params = [{transform_indices = @transform_0, window_bounds = array<i64: 8, 1>}, {transform_indices = @transform_1, window_bounds = array<i64: 8, 32>}, {transform_indices = @transform_2, window_bounds = array<i64: 8, 32>}, {transform_indices = @transform_3, window_bounds = array<i64: 8, 32>}, {transform_indices = @transform_4, window_bounds = array<i64: 1, 8, 128>}]} {
    %c0 = arith.constant 0 : index
    %c0_0 = arith.constant 0 : index
    %0 = vector.load %arg1[%c0, %c0_0] : memref<8x1xi32, #tpu.memory_space<vmem>>, vector<8x1xi32>
    %c0_1 = arith.constant 0 : index
    %c0_2 = arith.constant 0 : index
    %1 = vector.load %arg2[%c0_1, %c0_2] : memref<8x32xf32, #tpu.memory_space<vmem>>, vector<8x32xf32>
    %c0_3 = arith.constant 0 : index
    %c0_4 = arith.constant 0 : index
    %2 = vector.load %arg3[%c0_3, %c0_4] : memref<8x32xf32, #tpu.memory_space<vmem>>, vector<8x32xf32>
    %c0_5 = arith.constant 0 : index
    %c0_6 = arith.constant 0 : index
    %3 = vector.load %arg4[%c0_5, %c0_6] : memref<8x32xf32, #tpu.memory_space<vmem>>, vector<8x32xf32>
    %4 = tpu.iota {dimensions = array<i32: 0>} : vector<8x1xi32>
    %c8_i32 = arith.constant 8 : i32
    %5 = arith.muli %arg0, %c8_i32 : i32
    %6 = vector.broadcast %5 : i32 to vector<8x1xi32>
    %7 = arith.addi %6, %4 : vector<8x1xi32>
    %c8_i32_7 = arith.constant 8 : i32
    %8 = vector.broadcast %c8_i32_7 : i32 to vector<8x1xi32>
    %9 = arith.cmpi slt, %7, %8 : vector<8x1xi32>
    %10 = tpu.iota {dimensions = array<i32: 1>} : vector<8x32xi32>
    %11 = vector.broadcast %0 : vector<8x1xi32> to vector<8x32xi32>
    %12 = arith.cmpi eq, %10, %11 : vector<8x32xi32>
    %cst = arith.constant dense<0xFF800000> : vector<8xf32>
    %13 = vector.multi_reduction <maximumf>, %1, %cst [1] : vector<8x32xf32> to vector<8xf32>
    %14 = vector.shape_cast %13 : vector<8xf32> to vector<8x1xf32>
    %cst_8 = arith.constant 0.000000e+00 : f32
    %15 = vector.broadcast %cst_8 : f32 to vector<8x32xf32>
    %16 = arith.select %12, %1, %15 : vector<8x32xi1>, vector<8x32xf32>
    %cst_9 = arith.constant dense<0.000000e+00> : vector<8xf32>
    %17 = vector.multi_reduction <add>, %16, %cst_9 [1] : vector<8x32xf32> to vector<8xf32>
    %18 = vector.shape_cast %17 : vector<8xf32> to vector<8x1xf32>
    %19 = vector.broadcast %14 : vector<8x1xf32> to vector<8x32xf32>
    %20 = arith.subf %1, %19 : vector<8x32xf32>
    %21 = math.exp %20 : vector<8x32xf32>
    %cst_10 = arith.constant 0.000000e+00 : f32
    %22 = vector.broadcast %cst_10 : f32 to vector<8x32xf32>
    %23 = arith.select %12, %22, %21 : vector<8x32xi1>, vector<8x32xf32>
    %cst_11 = arith.constant dense<0.000000e+00> : vector<8xf32>
    %24 = vector.multi_reduction <add>, %23, %cst_11 [1] : vector<8x32xf32> to vector<8xf32>
    %25 = vector.shape_cast %24 : vector<8xf32> to vector<8x1xf32>
    %26 = arith.subf %18, %14 : vector<8x1xf32>
    %27 = math.exp %26 : vector<8x1xf32>
    %28 = arith.addf %25, %27 : vector<8x1xf32>
    %29 = math.log %28 : vector<8x1xf32>
    %30 = arith.addf %14, %29 : vector<8x1xf32>
    %31 = arith.subf %18, %30 : vector<8x1xf32>
    %32 = math.exp %31 : vector<8x1xf32>
    %cst_12 = arith.constant 1.000000e+00 : f32
    %33 = vector.broadcast %cst_12 : f32 to vector<8x1xf32>
    %34 = arith.subf %32, %33 : vector<8x1xf32>
    %35 = arith.mulf %34, %34 : vector<8x1xf32>
    %cst_13 = arith.constant 0.000000e+00 : f32
    %36 = vector.broadcast %cst_13 : f32 to vector<8x1xf32>
    %37 = arith.subf %36, %35 : vector<8x1xf32>
    %cst_14 = arith.constant 5.000000e-01 : f32
    %38 = vector.broadcast %cst_14 : f32 to vector<8x1xf32>
    %39 = arith.divf %37, %38 : vector<8x1xf32>
    %40 = math.exp %39 : vector<8x1xf32>
    %cst_15 = arith.constant 1.000000e+00 : f32
    %41 = vector.broadcast %cst_15 : f32 to vector<8x1xf32>
    %42 = arith.subf %41, %40 : vector<8x1xf32>
    %43 = arith.mulf %18, %42 : vector<8x1xf32>
    %44 = arith.maximumf %14, %43 : vector<8x1xf32>
    %45 = arith.subf %14, %44 : vector<8x1xf32>
    %46 = math.exp %45 : vector<8x1xf32>
    %47 = arith.mulf %25, %46 : vector<8x1xf32>
    %48 = arith.subf %43, %44 : vector<8x1xf32>
    %49 = math.exp %48 : vector<8x1xf32>
    %50 = arith.addf %47, %49 : vector<8x1xf32>
    %51 = math.log %50 : vector<8x1xf32>
    %52 = arith.addf %44, %51 : vector<8x1xf32>
    %53 = arith.subf %52, %43 : vector<8x1xf32>
    %cst_16 = arith.constant 0.000000e+00 : f32
    %54 = vector.broadcast %cst_16 : f32 to vector<8x32xf32>
    %55 = arith.select %12, %2, %54 : vector<8x32xi1>, vector<8x32xf32>
    %cst_17 = arith.constant dense<0.000000e+00> : vector<8xf32>
    %56 = vector.multi_reduction <add>, %55, %cst_17 [1] : vector<8x32xf32> to vector<8xf32>
    %57 = vector.shape_cast %56 : vector<8xf32> to vector<8x1xf32>
    %cst_18 = arith.constant 1.000000e+00 : f32
    %58 = vector.broadcast %cst_18 : f32 to vector<8x1xf32>
    %59 = arith.subf %58, %57 : vector<8x1xf32>
    %cst_19 = arith.constant dense<0xFF800000> : vector<8xf32>
    %60 = vector.multi_reduction <maximumf>, %3, %cst_19 [1] : vector<8x32xf32> to vector<8xf32>
    %61 = vector.shape_cast %60 : vector<8xf32> to vector<8x1xf32>
    %62 = vector.broadcast %61 : vector<8x1xf32> to vector<8x32xf32>
    %63 = arith.subf %3, %62 : vector<8x32xf32>
    %64 = math.exp %63 : vector<8x32xf32>
    %cst_20 = arith.constant dense<0.000000e+00> : vector<8xf32>
    %65 = vector.multi_reduction <add>, %64, %cst_20 [1] : vector<8x32xf32> to vector<8xf32>
    %66 = vector.shape_cast %65 : vector<8xf32> to vector<8x1xf32>
    %67 = math.log %66 : vector<8x1xf32>
    %68 = arith.addf %61, %67 : vector<8x1xf32>
    %cst_21 = arith.constant 0.000000e+00 : f32
    %69 = vector.broadcast %cst_21 : f32 to vector<8x32xf32>
    %70 = arith.select %12, %3, %69 : vector<8x32xi1>, vector<8x32xf32>
    %cst_22 = arith.constant dense<0.000000e+00> : vector<8xf32>
    %71 = vector.multi_reduction <add>, %70, %cst_22 [1] : vector<8x32xf32> to vector<8xf32>
    %72 = vector.shape_cast %71 : vector<8xf32> to vector<8x1xf32>
    %73 = arith.subf %68, %72 : vector<8x1xf32>
    %cst_23 = arith.constant 0.000000e+00 : f32
    %74 = vector.broadcast %cst_23 : f32 to vector<8x1xf32>
    %75 = arith.select %9, %53, %74 : vector<8x1xi1>, vector<8x1xf32>
    %cst_24 = arith.constant dense<0.000000e+00> : vector<1xf32>
    %76 = vector.multi_reduction <add>, %75, %cst_24 [0] : vector<8x1xf32> to vector<1xf32>
    %77 = vector.shape_cast %76 : vector<1xf32> to vector<1x1xf32>
    %cst_25 = arith.constant 0.000000e+00 : f32
    %78 = vector.broadcast %cst_25 : f32 to vector<8x1xf32>
    %79 = arith.select %9, %59, %78 : vector<8x1xi1>, vector<8x1xf32>
    %cst_26 = arith.constant dense<0.000000e+00> : vector<1xf32>
    %80 = vector.multi_reduction <add>, %79, %cst_26 [0] : vector<8x1xf32> to vector<1xf32>
    %81 = vector.shape_cast %80 : vector<1xf32> to vector<1x1xf32>
    %cst_27 = arith.constant 0.000000e+00 : f32
    %82 = vector.broadcast %cst_27 : f32 to vector<8x1xf32>
    %83 = arith.select %9, %73, %82 : vector<8x1xi1>, vector<8x1xf32>
    %cst_28 = arith.constant dense<0.000000e+00> : vector<1xf32>
    %84 = vector.multi_reduction <add>, %83, %cst_28 [0] : vector<8x1xf32> to vector<1xf32>
    %85 = vector.shape_cast %84 : vector<1xf32> to vector<1x1xf32>
    %86 = tpu.iota {dimensions = array<i32: 0>} : vector<8x128xi32>
    %c0_i32 = arith.constant 0 : i32
    %87 = vector.broadcast %c0_i32 : i32 to vector<8x128xi32>
    %88 = arith.cmpi eq, %86, %87 : vector<8x128xi32>
    %cst_29 = arith.constant 0.000000e+00 : f32
    %89 = vector.shape_cast %77 : vector<1x1xf32> to vector<1x1xf32>
    %90 = vector.broadcast %89 : vector<1x1xf32> to vector<8x128xf32>
    %91 = vector.broadcast %cst_29 : f32 to vector<8x128xf32>
    %92 = arith.select %88, %90, %91 : vector<8x128xi1>, vector<8x128xf32>
    %c1_i32 = arith.constant 1 : i32
    %93 = vector.broadcast %c1_i32 : i32 to vector<8x128xi32>
    %94 = arith.cmpi eq, %86, %93 : vector<8x128xi32>
    %cst_30 = arith.constant 0.000000e+00 : f32
    %95 = vector.shape_cast %81 : vector<1x1xf32> to vector<1x1xf32>
    %96 = vector.broadcast %95 : vector<1x1xf32> to vector<8x128xf32>
    %97 = vector.broadcast %cst_30 : f32 to vector<8x128xf32>
    %98 = arith.select %94, %96, %97 : vector<8x128xi1>, vector<8x128xf32>
    %99 = arith.addf %92, %98 : vector<8x128xf32>
    %c2_i32 = arith.constant 2 : i32
    %100 = vector.broadcast %c2_i32 : i32 to vector<8x128xi32>
    %101 = arith.cmpi eq, %86, %100 : vector<8x128xi32>
    %cst_31 = arith.constant 0.000000e+00 : f32
    %102 = vector.shape_cast %85 : vector<1x1xf32> to vector<1x1xf32>
    %103 = vector.broadcast %102 : vector<1x1xf32> to vector<8x128xf32>
    %104 = vector.broadcast %cst_31 : f32 to vector<8x128xf32>
    %105 = arith.select %101, %103, %104 : vector<8x128xi1>, vector<8x128xf32>
    %106 = arith.addf %99, %105 : vector<8x128xf32>
    %c0_32 = arith.constant 0 : index
    %c0_33 = arith.constant 0 : index
    %c0_34 = arith.constant 0 : index
    %107 = vector.load %arg5[%c0_32, %c0_33, %c0_34] : memref<1x8x128xf32, #tpu.memory_space<vmem>>, vector<1x8x128xf32>
    %108 = vector.shape_cast %107 : vector<1x8x128xf32> to vector<8x128xf32>
    %109 = vector.shape_cast %106 : vector<8x128xf32> to vector<1x8x128xf32>
    tpu.vector_store %arg5[%c0_32, %c0_33, %c0_34], %109 {strides = array<i32>} : memref<1x8x128xf32, #tpu.memory_space<vmem>>, vector<1x8x128xf32>,
    return
  }
  func.func @transform_0(%arg0: i32) -> (i32, i32) {
    %c0_i32 = arith.constant 0 : i32
    %c0_i32_0 = arith.constant 0 : i32
    return %arg0, %c0_i32 : i32, i32
  }
  func.func @transform_1(%arg0: i32) -> (i32, i32) {
    %c0_i32 = arith.constant 0 : i32
    %c0_i32_0 = arith.constant 0 : i32
    return %arg0, %c0_i32 : i32, i32
  }
  func.func @transform_2(%arg0: i32) -> (i32, i32) {
    %c0_i32 = arith.constant 0 : i32
    %c0_i32_0 = arith.constant 0 : i32
    return %arg0, %c0_i32 : i32, i32
  }
  func.func @transform_3(%arg0: i32) -> (i32, i32) {
    %c0_i32 = arith.constant 0 : i32
    %c0_i32_0 = arith.constant 0 : i32
    return %arg0, %c0_i32 : i32, i32
  }
  func.func @transform_4(%arg0: i32) -> (i32, i32, i32) {
    %c0_i32 = arith.constant 0 : i32
    %c0_i32_0 = arith.constant 0 : i32
    %c0_i32_1 = arith.constant 0 : i32
    return %arg0, %c0_i32, %c0_i32_0 : i32, i32, i32
  }
}

</mosaic_0001>

<bundles_post_ra>
// kernel: tpu_custom_call.1
= control target key start
LH: loop header
LB: loop body
LE: loop exit
PB: predicated region body
PF: predicated region fallthrough
CT: control target
= control target key end

     0   :  { %9 = vsyncpa [#allocation3], 0  ;;  %s354_s0 = inlined_call_operand.vmem [shape: s32[8,1], index: 0, kind: input, shape index: {}]   ;;  %s355_s1 = inlined_call_operand.vmem [shape: f32[8,32], index: 1, kind: input, shape index: {}]   ;;  %s356_s2 = inlined_call_operand.hbm [shape: f32[8,32], index: 2, kind: input, shape index: {}]   ;;  %s357_s3 = inlined_call_operand.hbm [shape: f32[8,32], index: 3, kind: input, shape index: {}]   ;;  %s358_s4 = inlined_call_operand.hbm [shape: f32[1,8,128], index: 4, kind: output, shape index: {}]  }
   0x1   :  { %10 = vsyncpa [#allocation6], 0 }
   0x2   :  { %11 = vsyncpa [#allocation4], 0  ;;  %s21_s17 = sshll.u32 %s356_s2, 4  ;;  %s292_s18 = smov [#allocation2]   ;;  %s22_s17 = int_to_ptr.hbm [resolvable:$true] %s21_s17 }
   0x3   :  { %s23_s19 = sshll.u32 %s292_s18, 4  ;;  %s32_s22 = sshll.u32 %s357_s3, 4  ;;  %s24_s19 = int_to_ptr.vmem [resolvable:$true] %s23_s19  ;;  %s33_s22 = int_to_ptr.hbm [resolvable:$true] %s32_s22 }
   0x4   :  { %26 = dma.hbm_to_vmem [thread:$0]  %s22_s17, 128, %s24_s19, [#allocation3]  }
   0x5   :  { %s293_s23 = smov [#allocation5]  }
   0x6   :  { %s34_s24 = sshll.u32 %s293_s23, 4  ;;  %s35_s24 = int_to_ptr.vmem [resolvable:$true] %s34_s24 }
   0x7   :  { %37 = dma.hbm_to_vmem [thread:$0]  %s33_s22, 128, %s35_s24, [#allocation6]  }
   0x8   :  { %286 = dma.done.wait [#allocation3], 128  }
   0x9   :  { %287 = vsyncadd [#allocation3], 4294967168 }
   0xa   :  { %288 = dma.done.wait [#allocation6], 128  }
   0xb   :  { %289 = vsyncadd [#allocation6], 4294967168  ;;  %v294_v0 = vmov 0   ;;  %vm62_vm0 = vcmask 261120   ;;  %v46_v1 = vld [vmem:[%s354_s0] sm:$0xff]  ;;  %v49_v2 = vld [vmem:[#allocation5] sm:$0xff]  ;;  %v50_v6 = vlaneseq }
   0xc   :  { %191 = vset.pattern.permute.xlu0 %v294_v0  ;;  %v120_v3 = vsel %vm62_vm0, %v49_v2, -inf  ;;  %v47_v4 = vld [vmem:[%s355_s1] sm:$0xff]  ;;  %v295_v33 = vmov 0.5   ;;  %s296_s0 = smov [#allocation7]   ;;  %s174_s29 = sshll.u32 %s358_s4, 4  ;;  %s175_s29 = int_to_ptr.hbm [resolvable:$true] %s174_s29 }
   0xd   :  { %59 = vperm.xlu0 %191, %v46_v1   ;;  %121 = vmax.xlane.f32.xlu2 %v120_v3  ;;  %v63_v5 = vsel %vm62_vm0, %v47_v4, -inf  ;;  %v57_v7 = vand.u32 127, %v50_v6  ;;  %v48_v24 = vld [vmem:[#allocation2] sm:$0xff]  ;;  %s172_s1 = sshll.u32 %s296_s0, 4  ;;  %s173_s1 = int_to_ptr.vmem [resolvable:$true] %s172_s1 }
  0x37   :  { %64 = vmax.xlane.f32.xlu0 %v63_v5 }
  0x7f   :  { %v60_v8 = vpop.permute.xlu0 %59 }
  0x80   :  { %vm61_vm1 = vcmp.eq.s32.totalorder %v57_v7, %v60_v8  ;;  %v337_v9 = vpop.xlane.xlu2 %121 }
  0x81   :  { %v66_v10 = vsel %vm61_vm1, %v47_v4, 0.0  ;;  %v123_v11 = vsub.f32 %v49_v2, %v337_v9  ;;  %v132_v16 = vsel %vm61_vm1, %v49_v2, 0.0  ;;  %v115_v25 = vsel %vm61_vm1, %v48_v24, 0.0 }
  0x82   :  { %v67_v12 = vsel %vm62_vm0, %v66_v10, 0.0  ;;  %v133_v17 = vsel %vm62_vm0, %v132_v16, 0.0  ;;  %v116_v26 = vsel %vm62_vm0, %v115_v25, 0.0 }
  0x83   :  { %68 = vadd.xlane.f32.xlu1 %v67_v12  ;;  %v124_v13 = vmul.f32 1.442695, %v123_v11 }
  0x85   :  { %192 = vpow2.f32 %v124_v13 }
  0x8b   :  { %v193_v14 = vpop.eup %192 }
  0x8c   :  { %v126_v15 = vsel %vm62_vm0, %v193_v14, 0.0 }
  0x8d   :  { %127 = vadd.xlane.f32.xlu2 %v126_v15 }
  0x95   :  { %134 = vadd.xlane.f32.xlu2 %v133_v17 }
  0xaa   :  { %v65_v18 = vpop.xlane.xlu0 %64 }
  0xab   :  { %v70_v19 = vsub.f32 %v47_v4, %v65_v18 }
  0xad   :  { %v71_v20 = vmul.f32 1.442695, %v70_v19 }
  0xaf   :  { %194 = vpow2.f32 %v71_v20 }
  0xb5   :  { %v195_v21 = vpop.eup %194 }
  0xb6   :  { %v73_v22 = vsel %vm61_vm1, 0.0, %v195_v21 }
  0xb7   :  { %v74_v23 = vsel %vm62_vm0, %v73_v22, 0.0 }
  0xb8   :  { %75 = vadd.xlane.f32.xlu1 %v74_v23 }
  0xc0   :  { %117 = vadd.xlane.f32.xlu1 %v116_v26  ;;  %v51_v26 = vshrl.u32 %v50_v6, 7 }
  0xc2   :  { %vm160_vm3 = vcmp.eq.s32.totalorder %v51_v26, 1  ;;  %vm158_vm4 = vcmp.eq.s32.totalorder %v51_v26, 0  ;;  %vm163_vm5 = vcmp.eq.s32.totalorder %v51_v26, 2 }
  0xf6   :  { %v69_v27 = vpop.xlane.xlu1 %68 }
  0xf7   :  { %v77_v28 = vsub.f32 %v69_v27, %v65_v18 }
  0xf9   :  { %v78_v29 = vmul.f32 1.442695, %v77_v28 }
  0xfb   :  { %196 = vpow2.f32 %v78_v29 }
  0xfc   :  { %198 = vrcp.f32 %v295_v33 }
 0x100   :  { %v128_v52 = vpop.xlane.xlu2 %127 }
 0x101   :  { %v197_v30 = vpop.eup %196 }
 0x102   :  { %v199_v34 = vpop.eup %198 }
 0x103   :  { %v91_v37 = vmul.f32 0.5, %v199_v34  ;;  %vm95_vm2 = vweird.f32 %v199_v34 }
 0x105   :  { %v92_v40 = vsub.f32 1.0, %v91_v37 }
 0x107   :  { %v93_v42 = vmul.f32 %v199_v34, %v92_v40 }
 0x108   :  { %v135_v4 = vpop.xlane.xlu2 %134 }
 0x109   :  { %v94_v44 = vadd.f32 %v199_v34, %v93_v42 }
 0x10b   :  { %v96_v47 = vsel %vm95_vm2, %v199_v34, %v94_v44 }
 0x12b   :  { %v76_v31 = vpop.xlane.xlu1 %75 }
 0x12c   :  { %v80_v32 = vadd.f32 %v197_v30, %v76_v31 }
 0x12e   :  { %200 = vlog2.f32 %v80_v32 }
 0x133   :  { %v118_v62 = vpop.xlane.xlu1 %117 }
 0x134   :  { %v201_v35 = vpop.eup %200  ;;  %v119_v3 = vsub.f32 1.0, %v118_v62 }
 0x135   :  { %v82_v36 = vmul.f32 0.6931472, %v201_v35 }
 0x136   :  { %v145_v8 = vrot.slane %v119_v3, 4 }
 0x137   :  { %v83_v38 = vadd.f32 %v82_v36, %v65_v18 }
 0x138   :  { %v146_v11 = vadd.f32 %v145_v8, %v119_v3 }
 0x139   :  { %v84_v39 = vsub.f32 %v69_v27, %v83_v38 }
 0x13a   :  { %v147_v16 = vrot.slane %v146_v11, 2 }
 0x13b   :  { %v85_v41 = vmul.f32 1.442695, %v84_v39 }
 0x13c   :  { %v148_v20 = vadd.f32 %v147_v16, %v146_v11 }
 0x13d   :  { %202 = vpow2.f32 %v85_v41 }
 0x13e   :  { %v149_v23 = vrot.slane %v148_v20, 1 }
 0x143   :  { %v203_v43 = vpop.eup %202 }
 0x144   :  { %v185_v45 = vadd.f32 -1.0, %v203_v43 }
 0x146   :  { %v88_v46 = vmul.f32 %v185_v45, %v185_v45 }
 0x148   :  { %v89_v48 = vsub.f32 0.0, %v88_v46 }
 0x14a   :  { %v97_v49 = vmul.f32 %v96_v47, %v89_v48 }
 0x14c   :  { %v98_v50 = vmul.f32 1.442695, %v97_v49 }
 0x14e   :  { %204 = vpow2.f32 %v98_v50 }
 0x14f   :  { %206 = vlog2.f32 %v128_v52 }
 0x154   :  { %v205_v51 = vpop.eup %204 }
 0x155   :  { %v100_v53 = vsub.f32 1.0, %v205_v51  ;;  %v207_v60 = vpop.eup %206 }
 0x156   :  { %v130_v61 = vmul.f32 0.6931472, %v207_v60 }
 0x157   :  { %v101_v54 = vmul.f32 %v100_v53, %v69_v27  ;;  %v150_v27 = vadd.f32 %v149_v23, %v148_v20 }
 0x158   :  { %v131_v0 = vadd.f32 %v130_v61, %v337_v9 }
 0x159   :  { %v102_v55 = vmax.f32 %v65_v18, %v101_v54 }
 0x15a   :  { %v136_v7 = vsub.f32 %v131_v0, %v135_v4 }
 0x15b   :  { %v103_v56 = vsub.f32 %v65_v18, %v102_v55  ;;  %v107_v57 = vsub.f32 %v101_v54, %v102_v55 }
 0x15c   :  { %v152_v10 = vrot.slane %v136_v7, 4 }
 0x15d   :  { %v104_v58 = vmul.f32 1.442695, %v103_v56  ;;  %v108_v59 = vmul.f32 1.442695, %v107_v57 }
 0x15e   :  { %v153_v13 = vadd.f32 %v152_v10, %v136_v7 }
 0x15f   :  { %208 = vpow2.f32 %v104_v58 }
 0x160   :  { %210 = vpow2.f32 %v108_v59  ;;  %v154_v17 = vrot.slane %v153_v13, 2 }
 0x162   :  { %v155_v9 = vadd.f32 %v154_v17, %v153_v13 }
 0x164   :  { %v156_v24 = vrot.slane %v155_v9, 1 }
 0x165   :  { %v209_v63 = vpop.eup %208 }
 0x166   :  { %v106_v1 = vmul.f32 %v209_v63, %v76_v31  ;;  %v211_v2 = vpop.eup %210  ;;  %v157_v29 = vadd.f32 %v156_v24, %v155_v9  ;;  %v161_v31 = vsel %vm160_vm3, %v150_v27, 0.0 }
 0x168   :  { %v110_v5 = vadd.f32 %v211_v2, %v106_v1  ;;  %v164_v34 = vsel %vm163_vm5, %v157_v29, 0.0 }
 0x16a   :  { %212 = vlog2.f32 %v110_v5 }
 0x170   :  { %v213_v12 = vpop.eup %212 }
 0x171   :  { %v112_v14 = vmul.f32 0.6931472, %v213_v12 }
 0x173   :  { %v113_v15 = vadd.f32 %v112_v14, %v102_v55 }
 0x175   :  { %v114_v18 = vsub.f32 %v113_v15, %v101_v54 }
 0x177   :  { %v138_v19 = vrot.slane %v114_v18, 4 }
 0x179   :  { %v139_v21 = vadd.f32 %v138_v19, %v114_v18 }
 0x17b   :  { %v140_v22 = vrot.slane %v139_v21, 2 }
 0x17d   :  { %v141_v25 = vadd.f32 %v140_v22, %v139_v21 }
 0x17f   :  { %v142_v28 = vrot.slane %v141_v25, 1 }
 0x181   :  { %v143_v30 = vadd.f32 %v142_v28, %v141_v25 }
 0x183   :  { %v159_v32 = vsel %vm158_vm4, %v143_v30, 0.0 }
 0x184   :  { %v162_v33 = vadd.f32 %v161_v31, %v159_v32 }
 0x186   :  { %v165_v35 = vadd.f32 %v164_v34, %v162_v33 }
 0x188   :  { %166 = vst [vmem:[#allocation7] sm:$0xff] %v165_v35 }
 0x189   :  { %177 = dma.vmem_to_hbm [thread:$0]  %s173_s1, 128, %s175_s29, [#allocation4]  }
 0x18a   :  { %290 = dma.done.wait [#allocation4], 128  }
 0x18b   :  { %291 = vsyncadd [#allocation4], 4294967168 }
 0x18c   :  { %182 = vsyncpa [#allocation3], 1 }
 0x18d   :  { %183 = vsyncpa [#allocation6], 1 }
 0x18e   :  { %184 = vsyncpa [#allocation4], 1 }

</bundles_post_ra>
